<compile_context>
chip_gen: v7x
topology: tpu7x:2x2x1
jax: 0.10.0
libtpu: 0.0.40
codegen_flags: <defaults>
</compile_context>

<pallas_src>
import functools

import jax
import jax.numpy as jnp
from jax.experimental import pallas as pl
from jax.experimental.pallas import tpu as pltpu


def _round_up(v, m):
    return ((v + m - 1) // m) * m


def _sublane(dtype):
    # f32 -> 8, bf16 -> 16, int8/fp8 -> 32 (sub-32-bit dtypes pack along sublanes).
    return max(8, 32 // jnp.dtype(dtype).itemsize)


def _tpu_vmem_capacity_bytes():
    """Physical VMEM per core; conservative 64 MiB (v7x) fallback."""
    try:
        return int(pltpu.get_tpu_info().vmem_capacity_bytes)
    except Exception:
        return 64 * 1024 * 1024


def _single_buffered_kwargs():
    # Grid-invariant operands only need one VMEM buffer.
    if hasattr(pl, "Buffered"):
        return {"pipeline_mode": pl.Buffered(1)}
    return {}


# ---------------------------------------------------------------------------
# Kernel A: fully weight-resident.  Grid = (batch tiles,).
# ---------------------------------------------------------------------------
def resid_kernel_resident(x_ref, w1_ref, b1_ref, w2_ref, b2_ref, o_ref):
    x = x_ref[...]
    xm = x.astype(w1_ref.dtype)                     # MXU feed dtype (bf16-capable)
    h = jnp.dot(xm, w1_ref[...], preferred_element_type=jnp.float32)
    h = jnp.maximum(h + b1_ref[...], 0.0)
    y = jnp.dot(h.astype(w2_ref.dtype), w2_ref[...],
                preferred_element_type=jnp.float32)
    y = jnp.maximum(y + b2_ref[...] + x.astype(jnp.float32), 0.0)
    o_ref[...] = y.astype(o_ref.dtype)


# ---------------------------------------------------------------------------
# Kernel B: feature-tiled variant for weights too large to keep resident.
# Grid = (batch tiles, feature tiles); feature axis last / "arbitrary".
#   step k:  h_k  = relu(x @ w1[:, k-tile] + b1[k-tile])     (N-tile of fc1)
#            acc += h_k @ w2[k-tile, :]                       (K-tile of fc2)
#   epilogue: out = relu(acc + b2 + x)
# ---------------------------------------------------------------------------
def resid_kernel_tiled(x_ref, w1_ref, b1_ref, w2_ref, b2_ref, o_ref, acc_ref):
    k = pl.program_id(1)

    @pl.when(k == 0)
    def _():
        acc_ref[...] = jnp.zeros_like(acc_ref)

    x = x_ref[...]
    xm = x.astype(w1_ref.dtype)
    h = jnp.dot(xm, w1_ref[...], preferred_element_type=jnp.float32)
    h = jnp.maximum(h + b1_ref[...], 0.0)
    acc_ref[...] += jnp.dot(h.astype(w2_ref.dtype), w2_ref[...],
                            preferred_element_type=jnp.float32)

    @pl.when(k == pl.num_programs(1) - 1)
    def _():
        y = acc_ref[...] + b2_ref[...] + x.astype(jnp.float32)
        o_ref[...] = jnp.maximum(y, 0.0).astype(o_ref.dtype)


@functools.partial(
    jax.jit,
    static_argnames=("tile_b", "tile_f", "mxu_dtype", "force_tiled"))
def resid_layer(x, w1_t, b1, w2_t, b2, *, tile_b=None, tile_f=512,
                mxu_dtype=None, force_tiled=False):
    """Fused ResidLayer forward.

    x     : (B, F)
    w1_t  : (F, F)  fc1 weight transposed to (in, out)
    b1    : (F,)    fc1 bias
    w2_t  : (F, F)  fc2 weight transposed to (in, out)
    b2    : (F,)    fc2 bias
    mxu_dtype : optional dtype fed to the MXU (e.g. jnp.bfloat16); accumulation
                and the bias/residual/ReLU epilogue stay in f32.
    """
    B, F = x.shape
    Fp = _round_up(F, 128)                      # lane-dense feature dim
    sub = _sublane(x.dtype)

    # ---- batch tile: multiple of sublane, >= ~4 grid steps when B permits,
    # and dividing B when possible (avoids any batch pad / HBM copy).
    if tile_b is None:
        target = max(sub, min(256, _round_up(-(-B // 4), sub)))
        tile_b = target
        if B % target != 0:
            for t in range(target, sub - 1, -sub):
                if B % t == 0:
                    tile_b = t
                    break
    else:
        tile_b = max(sub, _round_up(int(tile_b), sub))
    Bp = _round_up(B, tile_b)
    grid_b = Bp // tile_b

    # ---- operand prep (trace-time branches: no copies when already aligned).
    w_dtype = jnp.dtype(w1_t.dtype) if mxu_dtype is None else jnp.dtype(mxu_dtype)

    if Bp != B or Fp != F:
        x_p = jnp.pad(x, ((0, Bp - B), (0, Fp - F)))
    else:
        x_p = x

    def _prep_w(w):
        if Fp != F:
            w = jnp.pad(w, ((0, Fp - F), (0, Fp - F)))
        if w.dtype != w_dtype:
            w = w.astype(w_dtype)
        return w

    def _prep_b(b):
        if Fp != F:
            b = jnp.pad(b, (0, Fp - F))
        return b.astype(jnp.float32).reshape(1, Fp)

    w1_p, w2_p = _prep_w(w1_t), _prep_w(w2_t)
    b1_p, b2_p = _prep_b(b1), _prep_b(b2)

    # ---- VMEM budgeting / variant choice (generation-aware).
    vmem_cap = _tpu_vmem_capacity_bytes()
    w_isz = w_dtype.itemsize
    x_isz = jnp.dtype(x.dtype).itemsize
    act_bytes = tile_b * Fp * x_isz                      # one x or out tile
    resident_est = (2 * Fp * Fp * w_isz                  # w1+w2, single-buffered
                    + 2 * 2 * act_bytes                  # x + out, double-buffered
                    + 4 * tile_b * Fp * 4                # live f32 intermediates
                    + 2 * 8 * Fp * 4)                    # biases (sublane-padded)
    use_tiled = force_tiled or (resident_est > int(0.6 * vmem_cap))

    flops = 4 * Bp * Fp * Fp

    if not use_tiled:
        bytes_accessed = int(2 * Bp * Fp * x_isz + 2 * Fp * Fp * w_isz + 2 * Fp * 4)
        vmem_limit = int(min(max(int(resident_est * 1.25), 32 * 1024 * 1024),
                             int(0.9 * vmem_cap)))
        sbuf = _single_buffered_kwargs()
        out_p = pl.pallas_call(
            resid_kernel_resident,
            out_shape=jax.ShapeDtypeStruct((Bp, Fp), x.dtype),
            grid_spec=pltpu.PrefetchScalarGridSpec(
                num_scalar_prefetch=0,
                grid=(grid_b,),
                in_specs=[
                    pl.BlockSpec((tile_b, Fp), lambda i: (i, 0)),   # x tile
                    pl.BlockSpec((Fp, Fp), lambda i: (0, 0), **sbuf),  # w1
                    pl.BlockSpec((1, Fp), lambda i: (0, 0), **sbuf),   # b1
                    pl.BlockSpec((Fp, Fp), lambda i: (0, 0), **sbuf),  # w2
                    pl.BlockSpec((1, Fp), lambda i: (0, 0), **sbuf),   # b2
                ],
                out_specs=pl.BlockSpec((tile_b, Fp), lambda i: (i, 0)),
            ),
            compiler_params=pltpu.CompilerParams(
                dimension_semantics=("parallel",),
                vmem_limit_bytes=vmem_limit,
            ),
            cost_estimate=pl.CostEstimate(
                flops=int(flops), transcendentals=0,
                bytes_accessed=bytes_accessed),
        )(x_p, w1_p, b1_p, w2_p, b2_p)
    else:
        # Feature tile: multiple of 128, dividing Fp.
        tf = min(_round_up(max(int(tile_f), 128), 128), Fp)
        while Fp % tf != 0:
            tf -= 128
        grid_f = Fp // tf

        tiled_est = (2 * 2 * Fp * tf * w_isz             # w1/w2 tiles, double-buf
                     + 2 * 2 * act_bytes                 # x + out tiles
                     + tile_b * Fp * 4                   # acc scratch
                     + 4 * tile_b * Fp * 4               # live f32 intermediates
                     + 2 * 8 * Fp * 4)
        bytes_accessed = int(2 * Bp * Fp * x_isz
                             + 2 * grid_b * Fp * Fp * w_isz + 2 * Fp * 4)
        vmem_limit = int(min(max(int(tiled_est * 1.25), 32 * 1024 * 1024),
                             int(0.9 * vmem_cap)))
        out_p = pl.pallas_call(
            resid_kernel_tiled,
            out_shape=jax.ShapeDtypeStruct((Bp, Fp), x.dtype),
            grid_spec=pltpu.PrefetchScalarGridSpec(
                num_scalar_prefetch=0,
                grid=(grid_b, grid_f),
                in_specs=[
                    pl.BlockSpec((tile_b, Fp), lambda i, k: (i, 0)),  # x (full K)
                    pl.BlockSpec((Fp, tf), lambda i, k: (0, k)),      # w1 N-tile
                    pl.BlockSpec((1, tf), lambda i, k: (0, k)),       # b1 tile
                    pl.BlockSpec((tf, Fp), lambda i, k: (k, 0)),      # w2 K-tile
                    pl.BlockSpec((1, Fp), lambda i, k: (0, 0)),       # b2
                ],
                out_specs=pl.BlockSpec((tile_b, Fp), lambda i, k: (i, 0)),
                scratch_shapes=[pltpu.VMEM((tile_b, Fp), jnp.float32)],
            ),
            compiler_params=pltpu.CompilerParams(
                dimension_semantics=("parallel", "arbitrary"),
                vmem_limit_bytes=vmem_limit,
            ),
            cost_estimate=pl.CostEstimate(
                flops=int(flops), transcendentals=0,
                bytes_accessed=bytes_accessed),
        )(x_p, w1_p, b1_p, w2_p, b2_p)

    if Bp != B or Fp != F:
        return out_p[:B, :F]
    return out_p


def reference(x, w1_t, b1, w2_t, b2):
    """Pure-JAX reference matching the PyTorch forward."""
    out = jnp.maximum(x @ w1_t + b1, 0.0)
    out = out @ w2_t + b2
    out = out + x
    return jnp.maximum(out, 0.0)


def _make_params(key, size, dtype=jnp.float32):
    kw1, kb1, kw2, kb2 = jax.random.split(key, 4)
    bound = 1.0 / jnp.sqrt(jnp.float32(size))
    w1 = jax.random.uniform(kw1, (size, size), jnp.float32, -bound, bound)
    b1 = jax.random.uniform(kb1, (size,), jnp.float32, -bound, bound)
    w2 = jax.random.uniform(kw2, (size, size), jnp.float32, -bound, bound)
    b2 = jax.random.uniform(kb2, (size,), jnp.float32, -bound, bound)
    return (w1.T.astype(dtype), b1.astype(dtype),
            w2.T.astype(dtype), b2.astype(dtype))


if __name__ == "__main__":
    key = jax.random.PRNGKey(0)
    kparam, kx1, kx2, kx3, kx4 = jax.random.split(key, 5)

    # ---- Case 1: ResidLayer(32), small batch (resident path, exact f32).
    size = 32
    w1_t, b1, w2_t, b2 = _make_params(kparam, size)
    x = jax.random.normal(kx1, (8, size), dtype=jnp.float32)
    out = jax.block_until_ready(resid_layer(x, w1_t, b1, w2_t, b2))
    ref = reference(x, w1_t, b1, w2_t, b2)
    assert out.shape == (8, size)
    assert jnp.allclose(out, ref, atol=1e-5, rtol=1e-5), "mismatch (case 1)"

    # ---- Case 2: ragged batch, multi-step "parallel" grid (no batch padding
    # needed: tile_b auto-selected to divide B), feature padded 32 -> 128.
    x2 = jax.random.normal(kx2, (40, size), dtype=jnp.float32)
    out2 = jax.block_until_ready(resid_layer(x2, w1_t, b1, w2_t, b2))
    ref2 = reference(x2, w1_t, b1, w2_t, b2)
    assert out2.shape == (40, size)
    assert jnp.allclose(out2, ref2, atol=1e-5, rtol=1e-5), "mismatch (case 2)"

    # ---- Case 3: forced feature-tiled (K/N) variant with accumulator scratch
    # and pl.when epilogue (path used when weights exceed the VMEM budget).
    size3 = 256
    w1_t3, b1_3, w2_t3, b2_3 = _make_params(jax.random.PRNGKey(3), size3)
    x3 = jax.random.normal(kx3, (24, size3), dtype=jnp.float32)
    out3 = jax.block_until_ready(
        resid_layer(x3, w1_t3, b1_3, w2_t3, b2_3, tile_f=128, force_tiled=True))
    ref3 = reference(x3, w1_t3, b1_3, w2_t3, b2_3)
    assert out3.shape == (24, size3)
    assert jnp.allclose(out3, ref3, atol=1e-4, rtol=1e-4), "mismatch (tiled)"

    # ---- Case 4: bf16 MXU feed (weights cast once in the wrapper, f32
    # accumulation + f32 epilogue) -- the main v5e/v6e/v7x throughput lever.
    size4 = 128
    w1_t4, b1_4, w2_t4, b2_4 = _make_params(jax.random.PRNGKey(4), size4)
    x4 = jax.random.normal(kx4, (32, size4), dtype=jnp.float32)
    out4 = jax.block_until_ready(
        resid_layer(x4, w1_t4, b1_4, w2_t4, b2_4, mxu_dtype=jnp.bfloat16))
    ref4 = reference(x4, w1_t4, b1_4, w2_t4, b2_4)
    assert out4.shape == (32, size4)
    assert jnp.allclose(out4, ref4, atol=5e-2, rtol=5e-2), "mismatch (bf16)"

    print("KERNEL_OK")
</pallas_src>

<mosaic_0001>
module attributes {stable_mosaic.version = 11 : i64} {
  func.func @resid_kernel_resident(%arg0: i32, %arg1: memref<8x128xf32, #tpu.memory_space<vmem>>, %arg2: memref<128x128xf32, #tpu.memory_space<vmem>>, %arg3: memref<1x128xf32, #tpu.memory_space<vmem>>, %arg4: memref<128x128xf32, #tpu.memory_space<vmem>>, %arg5: memref<1x128xf32, #tpu.memory_space<vmem>>, %arg6: memref<8x128xf32, #tpu.memory_space<vmem>>) attributes {dimension_semantics = [#tpu.dimension_semantics<parallel>], iteration_bounds = array<i64: 1>, scalar_prefetch = 0 : i64, scratch_operands = 0 : i64, tpu.core_type = #tpu.core_type<tc>, window_params = [{transform_indices = @transform_0, window_bounds = array<i64: 8, 128>}, {pipeline_mode = #tpu.pipeline_mode<synchronous>, transform_indices = @transform_1, window_bounds = array<i64: 128, 128>}, {pipeline_mode = #tpu.pipeline_mode<synchronous>, transform_indices = @transform_2, window_bounds = array<i64: 1, 128>}, {pipeline_mode = #tpu.pipeline_mode<synchronous>, transform_indices = @transform_3, window_bounds = array<i64: 128, 128>}, {pipeline_mode = #tpu.pipeline_mode<synchronous>, transform_indices = @transform_4, window_bounds = array<i64: 1, 128>}, {transform_indices = @transform_5, window_bounds = array<i64: 8, 128>}]} {
    %c0 = arith.constant 0 : index
    %c0_0 = arith.constant 0 : index
    %0 = vector.load %arg1[%c0, %c0_0] : memref<8x128xf32, #tpu.memory_space<vmem>>, vector<8x128xf32>
    %c0_1 = arith.constant 0 : index
    %c0_2 = arith.constant 0 : index
    %1 = vector.load %arg2[%c0_1, %c0_2] : memref<128x128xf32, #tpu.memory_space<vmem>>, vector<128x128xf32>
    %cst = arith.constant dense<0.000000e+00> : vector<8x128xf32>
    %2 = tpu.matmul %0, %1, %cst {dimension_numbers = #tpu.dot_dimension_numbers<[1], [0], [0], [1], [0, 0, 1, 1], [], []>} : vector<8x128xf32>, vector<128x128xf32>, vector<8x128xf32> -> vector<8x128xf32>
    %c0_3 = arith.constant 0 : index
    %c0_4 = arith.constant 0 : index
    %3 = vector.load %arg3[%c0_3, %c0_4] : memref<1x128xf32, #tpu.memory_space<vmem>>, vector<1x128xf32>
    %4 = vector.broadcast %3 : vector<1x128xf32> to vector<8x128xf32>
    %5 = arith.addf %2, %4 : vector<8x128xf32>
    %cst_5 = arith.constant 0.000000e+00 : f32
    %6 = vector.broadcast %cst_5 : f32 to vector<8x128xf32>
    %7 = arith.maximumf %5, %6 : vector<8x128xf32>
    %c0_6 = arith.constant 0 : index
    %c0_7 = arith.constant 0 : index
    %8 = vector.load %arg4[%c0_6, %c0_7] : memref<128x128xf32, #tpu.memory_space<vmem>>, vector<128x128xf32>
    %cst_8 = arith.constant dense<0.000000e+00> : vector<8x128xf32>
    %9 = tpu.matmul %7, %8, %cst_8 {dimension_numbers = #tpu.dot_dimension_numbers<[1], [0], [0], [1], [0, 0, 1, 1], [], []>} : vector<8x128xf32>, vector<128x128xf32>, vector<8x128xf32> -> vector<8x128xf32>
    %c0_9 = arith.constant 0 : index
    %c0_10 = arith.constant 0 : index
    %10 = vector.load %arg5[%c0_9, %c0_10] : memref<1x128xf32, #tpu.memory_space<vmem>>, vector<1x128xf32>
    %11 = vector.broadcast %10 : vector<1x128xf32> to vector<8x128xf32>
    %12 = arith.addf %9, %11 : vector<8x128xf32>
    %13 = arith.addf %12, %0 : vector<8x128xf32>
    %cst_11 = arith.constant 0.000000e+00 : f32
    %14 = vector.broadcast %cst_11 : f32 to vector<8x128xf32>
    %15 = arith.maximumf %13, %14 : vector<8x128xf32>
    %c0_12 = arith.constant 0 : index
    %c0_13 = arith.constant 0 : index
    %16 = vector.load %arg6[%c0_12, %c0_13] : memref<8x128xf32, #tpu.memory_space<vmem>>, vector<8x128xf32>
    tpu.vector_store %arg6[%c0_12, %c0_13], %15 {strides = array<i32>} : memref<8x128xf32, #tpu.memory_space<vmem>>, vector<8x128xf32>,
    return
  }
  func.func @transform_0(%arg0: i32) -> (i32, i32) {
    %c0_i32 = arith.constant 0 : i32
    %c0_i32_0 = arith.constant 0 : i32
    return %arg0, %c0_i32 : i32, i32
  }
  func.func @transform_1(%arg0: i32) -> (i32, i32) {
    %c0_i32 = arith.constant 0 : i32
    %c0_i32_0 = arith.constant 0 : i32
    %c0_i32_1 = arith.constant 0 : i32
    return %c0_i32, %c0_i32_0 : i32, i32
  }
  func.func @transform_2(%arg0: i32) -> (i32, i32) {
    %c0_i32 = arith.constant 0 : i32
    %c0_i32_0 = arith.constant 0 : i32
    %c0_i32_1 = arith.constant 0 : i32
    return %c0_i32, %c0_i32_0 : i32, i32
  }
  func.func @transform_3(%arg0: i32) -> (i32, i32) {
    %c0_i32 = arith.constant 0 : i32
    %c0_i32_0 = arith.constant 0 : i32
    %c0_i32_1 = arith.constant 0 : i32
    return %c0_i32, %c0_i32_0 : i32, i32
  }
  func.func @transform_4(%arg0: i32) -> (i32, i32) {
    %c0_i32 = arith.constant 0 : i32
    %c0_i32_0 = arith.constant 0 : i32
    %c0_i32_1 = arith.constant 0 : i32
    return %c0_i32, %c0_i32_0 : i32, i32
  }
  func.func @transform_5(%arg0: i32) -> (i32, i32) {
    %c0_i32 = arith.constant 0 : i32
    %c0_i32_0 = arith.constant 0 : i32
    return %arg0, %c0_i32 : i32, i32
  }
}

</mosaic_0001>

<bundles_post_ra>
// kernel: resid_layer.1
= control target key start
LH: loop header
LB: loop body
LE: loop exit
PB: predicated region body
PF: predicated region fallthrough
CT: control target
= control target key end

     0   :  { %v408_v3 = vmov 0.0|0.0   ;;  %vm409_vm0 = vmmov 0   ;;  %v410_v6 = vmov 0.0   ;;  %s575_s0 = inlined_call_operand.vmem [shape: f32[8,128], index: 0, kind: input, shape index: {}]   ;;  %s576_s1 = inlined_call_operand.vmem [shape: f32[128,128], index: 1, kind: input, shape index: {}]   ;;  %s577_s2 = inlined_call_operand.vmem [shape: f32[1,128], index: 2, kind: input, shape index: {}]   ;;  %s578_s3 = inlined_call_operand.vmem [shape: f32[128,128], index: 3, kind: input, shape index: {}]   ;;  %s579_s4 = inlined_call_operand.vmem [shape: f32[1,128], index: 4, kind: input, shape index: {}]   ;;  %s580_s5 = inlined_call_operand.hbm [shape: f32[8,128], index: 5, kind: output, shape index: {}]  }
   0x1   :  { %v22_v0 = vld [vmem:[%s576_s1] sm:$0xff]  ;;  %v23_v1 = vld [vmem:[%s576_s1 + $0x8] sm:$0xff]  ;;  %v24_v2 = vld [vmem:[%s576_s1 + $0x10] sm:$0xff]  ;;  %332 = vmatprep.subr.bf16.mxu0 %v408_v3  ;;  %294 = vmatprep.mubr.msk.f32.mxu0 %vm409_vm0, %v410_v6 }
   0x2   :  { %v333_v4 = vpack.c.bf16 %v23_v1, %v22_v0  ;;  %v25_v5 = vld [vmem:[%s576_s1 + $0x18] sm:$0xff]  ;;  %356 = vmatprep.subr.bf16.mxu1 %v408_v3  ;;  %329 = vmatprep.mubr.msk.f32.mxu1 %vm409_vm0, %v410_v6  ;;  %v26_v8 = vld [vmem:[%s576_s1 + $0x20] sm:$0xff]  ;;  %v27_v9 = vld [vmem:[%s576_s1 + $0x28] sm:$0xff] }
   0x3   :  { %v336_v7 = vpack.c.bf16 %v25_v5, %v24_v2  ;;  %v116_v10 = vld [vmem:[%s578_s3] sm:$0xff]  ;;  %v117_v11 = vld [vmem:[%s578_s3 + $0x8] sm:$0xff]  ;;  %v118_v12 = vld [vmem:[%s578_s3 + $0x10] sm:$0xff]  ;;  %v339_v14 = vpack.c.bf16 %v27_v9, %v26_v8 }
   0x4   :  { %334 = vmatpush3.bf16.msra.mxu0 %v333_v4  ;;  %v119_v13 = vld [vmem:[%s578_s3 + $0x18] sm:$0xff]  ;;  %v357_v15 = vpack.c.bf16 %v117_v11, %v116_v10  ;;  %v28_v16 = vld [vmem:[%s576_s1 + $0x30] sm:$0xff]  ;;  %v120_v19 = vld [vmem:[%s578_s3 + $0x20] sm:$0xff] }
   0x5   :  { %335 = vmatprep.subr.bf16.mxu0 %v408_v3  ;;  %v29_v17 = vld [vmem:[%s576_s1 + $0x38] sm:$0xff]  ;;  %v360_v18 = vpack.c.bf16 %v119_v13, %v118_v12  ;;  %v121_v20 = vld [vmem:[%s578_s3 + $0x28] sm:$0xff] }
   0x6   :  { %358 = vmatpush3.bf16.msra.mxu1 %v357_v15 }
   0x7   :  { %359 = vmatprep.subr.bf16.mxu1 %v408_v3 }
   0x8   :  { %337 = vmatpush3.bf16.msra.mxu0 %v336_v7 }
   0x9   :  { %338 = vmatprep.subr.bf16.mxu0 %v408_v3 }
   0xa   :  { %10 = vsyncpa [#allocation3], 0  ;;  %v342_v21 = vpack.c.bf16 %v29_v17, %v28_v16  ;;  %v30_v22 = vld [vmem:[%s576_s1 + $0x40] sm:$0xff]  ;;  %v31_v23 = vld [vmem:[%s576_s1 + $0x48] sm:$0xff]  ;;  %361 = vmatpush3.bf16.msra.mxu1 %v360_v18  ;;  %v363_v24 = vpack.c.bf16 %v121_v20, %v120_v19  ;;  %s411_s11 = smov [#allocation2]  }
   0xb   :  { %362 = vmatprep.subr.bf16.mxu1 %v408_v3  ;;  %v122_v25 = vld [vmem:[%s578_s3 + $0x30] sm:$0xff]  ;;  %v123_v26 = vld [vmem:[%s578_s3 + $0x38] sm:$0xff]  ;;  %v345_v27 = vpack.c.bf16 %v31_v23, %v30_v22  ;;  %v124_v31 = vld [vmem:[%s578_s3 + $0x40] sm:$0xff] }
   0xc   :  { %340 = vmatpush3.bf16.msra.mxu0 %v339_v14  ;;  %v32_v28 = vld [vmem:[%s576_s1 + $0x50] sm:$0xff]  ;;  %v33_v29 = vld [vmem:[%s576_s1 + $0x58] sm:$0xff]  ;;  %v366_v30 = vpack.c.bf16 %v123_v26, %v122_v25  ;;  %v125_v32 = vld [vmem:[%s578_s3 + $0x48] sm:$0xff] }
   0xd   :  { %341 = vmatprep.subr.bf16.mxu0 %v408_v3  ;;  %v348_v33 = vpack.c.bf16 %v33_v29, %v32_v28  ;;  %v34_v34 = vld [vmem:[%s576_s1 + $0x60] sm:$0xff]  ;;  %v35_v35 = vld [vmem:[%s576_s1 + $0x68] sm:$0xff]  ;;  %v369_v36 = vpack.c.bf16 %v125_v32, %v124_v31  ;;  %v126_v37 = vld [vmem:[%s578_s3 + $0x50] sm:$0xff] }
   0xe   :  { %364 = vmatpush3.bf16.msra.mxu1 %v363_v24  ;;  %v127_v38 = vld [vmem:[%s578_s3 + $0x58] sm:$0xff]  ;;  %v351_v39 = vpack.c.bf16 %v35_v35, %v34_v34  ;;  %v36_v40 = vld [vmem:[%s576_s1 + $0x70] sm:$0xff]  ;;  %v128_v43 = vld [vmem:[%s578_s3 + $0x60] sm:$0xff] }
   0xf   :  { %365 = vmatprep.subr.bf16.mxu1 %v408_v3  ;;  %v37_v41 = vld [vmem:[%s576_s1 + $0x78] sm:$0xff]  ;;  %v372_v42 = vpack.c.bf16 %v127_v38, %v126_v37  ;;  %v129_v44 = vld [vmem:[%s578_s3 + $0x68] sm:$0xff]  ;;  %v21_v47 = vld [vmem:[%s575_s0] sm:$0xff] }
  0x10   :  { %343 = vmatpush3.bf16.msra.mxu0 %v342_v21  ;;  %v354_v45 = vpack.c.bf16 %v37_v41, %v36_v40  ;;  %v375_v46 = vpack.c.bf16 %v129_v44, %v128_v43  ;;  %v130_v48 = vld [vmem:[%s578_s3 + $0x70] sm:$0xff]  ;;  %v131_v49 = vld [vmem:[%s578_s3 + $0x78] sm:$0xff]  ;;  %v226_v51 = vld [vmem:[%s577_s2] ss:$0 sm:$0xff]  ;;  %s218_s3 = sshll.u32 %s411_s11, 4  ;;  %s219_s3 = int_to_ptr.vmem [resolvable:$true] %s218_s3 }
  0x11   :  { %344 = vmatprep.subr.bf16.mxu0 %v408_v3  ;;  %v378_v50 = vpack.c.bf16 %v131_v49, %v130_v48  ;;  %v227_v56 = vld [vmem:[%s579_s4] ss:$0 sm:$0xff]  ;;  %s384_s12 = scalar_lea.vmem %s219_s3, 128  ;;  %p389_p1 = scmp.lt.s32.totalorder %s219_s3, %s219_s3 }
  0x12   :  { %367 = vmatpush3.bf16.msra.mxu1 %v366_v30  ;;  %p385_p0 = scmp.ne.s32.totalorder %s219_s3, %s384_s12  ;;  %p390_p2 = scmp.lt.s32.totalorder %s384_s12, %s384_s12 }
  0x13   :  { %368 = vmatprep.subr.bf16.mxu1 %v408_v3 }
  0x14   :  { %346 = vmatpush3.bf16.msra.mxu0 %v345_v27  ;;  %p391_p3 = por %p390_p2, %p389_p1 }
  0x15   :  { %347 = vmatprep.subr.bf16.mxu0 %v408_v3 }
  0x16   :  { %370 = vmatpush3.bf16.msra.mxu1 %v369_v36  ;;  %p392_p4 = pnand %p391_p3, %p385_p0 }
  0x17   :  { %371 = vmatprep.subr.bf16.mxu1 %v408_v3 }
  0x18   :  { %349 = vmatpush3.bf16.msra.mxu0 %v348_v33 }
  0x19   :  { %350 = vmatprep.subr.bf16.mxu0 %v408_v3 }
  0x1a   :  { %373 = vmatpush3.bf16.msra.mxu1 %v372_v42 }
  0x1b   :  { %374 = vmatprep.subr.bf16.mxu1 %v408_v3 }
  0x1c   :  { %352 = vmatpush3.bf16.msra.mxu0 %v351_v39 }
  0x1d   :  { %353 = vmatprep.subr.bf16.mxu0 %v408_v3 }
  0x1e   :  { %376 = vmatpush3.bf16.msra.mxu1 %v375_v46 }
  0x1f   :  { %377 = vmatprep.subr.bf16.mxu1 %v408_v3 }
  0x20   :  { %355 = vmatpush3.bf16.msra.mxu0 %v354_v45 }
  0x22   :  { %379 = vmatpush3.bf16.msra.mxu1 %v378_v50 }
  0x23   :  { %295 = vmatmul.mubr.f32.vlgmr.msra.gmra.mrb[0].mxu0 %v21_v47 }
  0xf6   :  { %v111_v52 = vpop.f32.mrb[0].mxu0 }
  0xf7   :  { %v112_v53 = vadd.f32 %v226_v51, %v111_v52  ;;  %v296_v54 = vpop.f32.mrb[1].mxu0 }
  0xf9   :  { %v115_v55 = vmax.f32 %v112_v53, 0.0 }
  0xfb   :  { %330 = vmatmul.mubr.f32.vlgmr.msra.gmra.mrb[0].mxu1 %v115_v55 }
 0x1ce   :  { %v205_v57 = vpop.f32.mrb[0].mxu1 }
 0x1cf   :  { %v206_v58 = vadd.f32 %v227_v56, %v205_v57  ;;  %v331_v59 = vpop.f32.mrb[1].mxu1 }
 0x1d1   :  { %v209_v60 = vadd.f32 %v206_v58, %v21_v47 }
 0x1d3   :  { %v210_v61 = vmax.f32 %v209_v60, 0.0 }
 0x1d5   :  { %211 = vst [vmem:[#allocation2] sm:$0xff] %v210_v61 }
 0x1d6   :  { %395 = shalt.err (!%p392_p4)
}
 0x1d7   :  { %s396_s4 = scalar_lea.hbm %s580_s5, 128 }
 0x1d8   :  { %p397_p5 = scmp.ne.s32.totalorder %s580_s5, %s396_s4  ;;  %p400_p6 = scmp.lt.u32.totalorder %s396_s4, %s580_s5 }
 0x1da   :  { %p402_p7 = pnand %p400_p6, %p397_p5 }
 0x1dc   :  { %405 = shalt.err (!%p402_p7)
}
 0x1dd   :  { %221 = dma.vmem_to_hbm [thread:$0]  %s219_s3, 128, %s580_s5, [#allocation3]  }
 0x1de   :  { %406 = dma.done.wait [#allocation3], 128  }
 0x1df   :  { %407 = vsyncadd [#allocation3], 4294967168 }
 0x1e0   :  { %225 = vsyncpa [#allocation3], 1 }

</bundles_post_ra>
